<compile_context>
chip_gen: v5e
topology: v5e:2x2
jax: 0.10.0
libtpu: 0.0.40
codegen_flags: <defaults>
</compile_context>

<pallas_src>
import functools

import jax
import jax.numpy as jnp
from jax import lax
from jax.experimental import pallas as pl
from jax.experimental.pallas import tpu as pltpu


def _round_up(x, m):
    return ((x + m - 1) // m) * m


def _actor_critic_kernel(x_ref, aT_ref,
                         w1_ref, b1_ref, w2_ref, b2_ref, w3_ref, b3_ref,
                         extras_ref, out_ref, *, action_dim):
    """Fused actor/critic evaluate(), transposed (batch-on-lanes) compute.

    x_ref   : (tile, S)   state, natural layout (no host transpose)
    aT_ref  : (A, tile)   action, batch on lanes
    w1_ref  : (2E, S)     [actor|critic] layer-1 weights (transposed)
    w2_ref  : (2E, 2E)    block-diag layer-2 weights (transposed)
    w3_ref  : (A+1, 2E)   block-diag layer-3 weights (transposed)
    b*_ref  : column biases, f32
    extras  : (A+1, 1)    rows 0..A-1 = -0.5/var, row A = -0.5*(logdet + A*log2pi)
    out_ref : (2, tile)   row 0 = logprob, row 1 = state value (lane-dense)
    """
    cd = w1_ref.dtype                                   # MXU dtype (f32 or bf16)
    A = action_dim

    x = x_ref[...].astype(cd)                           # (tile, S)

    # ---- fused actor+critic MLP: 3 MXU matmuls, bias/tanh in f32 on VPU/EUP ----
    # L1 contracts the state axis of both operands (rhs-transposed matmul),
    # giving the hidden state directly in batch-on-lanes layout: (2E, tile).
    h = jnp.tanh(
        lax.dot_general(w1_ref[...], x, (((1,), (1,)), ((), ())),
                        preferred_element_type=jnp.float32) + b1_ref[...])
    h = jnp.tanh(
        jnp.dot(w2_ref[...], h.astype(cd),
                preferred_element_type=jnp.float32) + b2_ref[...])
    z = (jnp.dot(w3_ref[...], h.astype(cd),
                 preferred_element_type=jnp.float32) + b3_ref[...])      # (A+1, tile)

    mean = jnp.tanh(z[:A, :])                           # actor head (tanh)    (A, tile)
    value = z[A:A + 1, :]                               # critic head (linear) (1, tile)

    # ---- diagonal MultivariateNormal log_prob (constants hoisted) ----
    ext = extras_ref[...]                               # (A+1, 1) f32
    neg_half_inv_var = ext[:A, :]                       # (A, 1)  = -0.5 / var
    const = ext[A:A + 1, :]                             # (1, 1)  = -0.5*(logdet + A*log2pi)

    diff = aT_ref[...] - mean                           # (A, tile) f32
    logprob = jnp.sum(diff * diff * neg_half_inv_var,
                      axis=0, keepdims=True) + const    # (1, tile)

    # lane-dense output, two direct slice stores (no sublane concat copy)
    out_ref[0:1, :] = logprob
    out_ref[1:2, :] = value


def pack_params(params, action_var, *, param_dtype=jnp.float32):
    """One-time packing of actor/critic params + distribution constants.

    Do this ONCE per PPO update and reuse the result for every minibatch call.
    """
    S, E = params["aw1"].shape
    A = params["aw3"].shape[-1]

    zEE = jnp.zeros((E, E), jnp.float32)
    w1T = jnp.concatenate([params["aw1"].T, params["cw1"].T], axis=0)          # (2E, S)
    w2T = jnp.block([[params["aw2"].T, zEE],
                     [zEE, params["cw2"].T]])                                  # (2E, 2E)
    w3T = jnp.block([[params["aw3"].T, jnp.zeros((A, E), jnp.float32)],
                     [jnp.zeros((1, E), jnp.float32), params["cw3"].T]])       # (A+1, 2E)
    b1T = jnp.concatenate([params["ab1"], params["cb1"]], axis=1).T            # (2E, 1)
    b2T = jnp.concatenate([params["ab2"], params["cb2"]], axis=1).T            # (2E, 1)
    b3T = jnp.concatenate([params["ab3"], params["cb3"]], axis=1).T            # (A+1, 1)

    log2pi = jnp.log(2.0 * jnp.float32(jnp.pi))
    logdet = jnp.sum(jnp.log(action_var))
    const = -0.5 * (logdet + A * log2pi)
    extras = jnp.concatenate([-0.5 / action_var, const[None]]).reshape(A + 1, 1)
    entropy_const = 0.5 * (A * (1.0 + log2pi) + logdet)

    return dict(
        w1T=w1T.astype(param_dtype), b1T=b1T,
        w2T=w2T.astype(param_dtype), b2T=b2T,
        w3T=w3T.astype(param_dtype), b3T=b3T,
        extras=extras, entropy_const=entropy_const,
        state_dim=S, emb_size=E, action_dim=A, param_dtype=param_dtype,
    )


def evaluate_pallas(state, action, packed, *, tile_b=4096):
    """Fused evaluate(): returns (action_logprobs (B,), state_value (B,), entropy (B,)).

    `packed` comes from pack_params(). On v6e/v7x pass param_dtype=bfloat16 to
    pack_params to halve MXU-path HBM bytes (accumulation stays f32).
    """
    B, S = state.shape
    A = packed["action_dim"]
    E = packed["emb_size"]
    cd = packed["param_dtype"]

    # ---- batch tiling: lane-dense tiles, no padding, ragged last block ----
    tile_b = max(128, _round_up(tile_b, 128))
    B128 = _round_up(B, 128)
    tile = min(tile_b, B128)
    # keep >= 2 grid steps when there is enough work so both v7x TCs get a share
    if tile >= B128 and B128 >= 256:
        tile = _round_up(B128 // 2, 128)
    # tiny batches: a single exact block avoids any ragged edge at all
    if B <= 128 and B % 8 == 0:
        tile = B
    grid = (pl.cdiv(B, tile),)

    # state stays in its natural (B, S) layout -> zero extra HBM traffic.
    x = state if state.dtype == cd else state.astype(cd)
    # action is tiny (A << S); a transposed copy keeps the kernel math lane-dense.
    aT = action.astype(jnp.float32).T                    # (A, B)

    full = lambda shape: pl.BlockSpec(shape, lambda i: (0, 0))

    grid_spec = pltpu.PrefetchScalarGridSpec(
        num_scalar_prefetch=0,
        grid=grid,
        in_specs=[
            pl.BlockSpec((tile, S), lambda i: (i, 0)),   # state (natural layout)
            pl.BlockSpec((A, tile), lambda i: (0, i)),   # action^T (lane-dense)
            full((2 * E, S)), full((2 * E, 1)),          # fused L1
            full((2 * E, 2 * E)), full((2 * E, 1)),      # fused L2 (block-diag)
            full((A + 1, 2 * E)), full((A + 1, 1)),      # fused L3 (block-diag)
            full((A + 1, 1)),                            # extras: -0.5/var + const
        ],
        out_specs=pl.BlockSpec((2, tile), lambda i: (0, i)),   # row0=logprob, row1=value
    )

    out = pl.pallas_call(
        functools.partial(_actor_critic_kernel, action_dim=A),
        out_shape=jax.ShapeDtypeStruct((2, B), jnp.float32),
        grid_spec=grid_spec,
        compiler_params=pltpu.CompilerParams(dimension_semantics=("parallel",)),
    )(
        x, aT,
        packed["w1T"], packed["b1T"],
        packed["w2T"], packed["b2T"],
        packed["w3T"], packed["b3T"],
        packed["extras"],
    )

    # Matches torch: log_prob -> (B,), torch.squeeze(state_value) -> (B,), entropy -> (B,)
    logprob = out[0]
    value = out[1]
    entropy = jnp.full((B,), packed["entropy_const"], jnp.float32)
    return logprob, value, entropy


def init_params(key, state_dim, emb_size, action_dim):
    """Deterministic init mimicking nn.Linear defaults: U(-1/sqrt(fan_in), 1/sqrt(fan_in))."""
    def linear(k, fan_in, fan_out):
        kw, kb = jax.random.split(k)
        bound = 1.0 / jnp.sqrt(jnp.float32(fan_in))
        w = jax.random.uniform(kw, (fan_in, fan_out), jnp.float32, -bound, bound)
        b = jax.random.uniform(kb, (1, fan_out), jnp.float32, -bound, bound)
        return w, b

    keys = jax.random.split(key, 6)
    aw1, ab1 = linear(keys[0], state_dim, emb_size)
    aw2, ab2 = linear(keys[1], emb_size, emb_size)
    aw3, ab3 = linear(keys[2], emb_size, action_dim)
    cw1, cb1 = linear(keys[3], state_dim, emb_size)
    cw2, cb2 = linear(keys[4], emb_size, emb_size)
    cw3, cb3 = linear(keys[5], emb_size, 1)
    return dict(aw1=aw1, ab1=ab1, aw2=aw2, ab2=ab2, aw3=aw3, ab3=ab3,
                cw1=cw1, cb1=cb1, cw2=cw2, cb2=cb2, cw3=cw3, cb3=cb3)


def evaluate_ref(state, action, params, action_var):
    """Plain-JAX reference for correctness checking."""
    h = jnp.tanh(state @ params["aw1"] + params["ab1"])
    h = jnp.tanh(h @ params["aw2"] + params["ab2"])
    mean = jnp.tanh(h @ params["aw3"] + params["ab3"])
    g = jnp.tanh(state @ params["cw1"] + params["cb1"])
    g = jnp.tanh(g @ params["cw2"] + params["cb2"])
    value = (g @ params["cw3"] + params["cb3"])[:, 0]
    k = action.shape[-1]
    log_2pi = jnp.log(2.0 * jnp.pi)
    diff = action - mean
    maha = jnp.sum(diff * diff / action_var[None, :], axis=-1)
    logdet = jnp.sum(jnp.log(action_var))
    logprob = -0.5 * (maha + logdet + k * log_2pi)
    entropy = jnp.full((state.shape[0],), 0.5 * (k * (1.0 + log_2pi) + logdet))
    return logprob, value, entropy


if __name__ == "__main__":
    # TODO(synk): act()'s distribution.sample() RNG draw is not reproduced in-kernel
    # (handled host-side with jax.random); the deterministic evaluate() path
    # (fused MLPs + log_prob + entropy) is fully in Pallas.
    STATE_DIM, EMB, ACTION_DIM = 32, 32, 8
    ACTION_STD = 0.5

    key = jax.random.PRNGKey(0)
    kp, ks, ka = jax.random.split(key, 3)
    params = init_params(kp, STATE_DIM, EMB, ACTION_DIM)
    action_var = jnp.full((ACTION_DIM,), ACTION_STD * ACTION_STD, jnp.float32)

    packed = pack_params(params, action_var)     # one-time packing (reused per call)

    # exercise both the exact-single-block path (B=16) and the
    # multi-step ragged-last-block path (B=300, grid of 2 parallel steps)
    for batch in (16, 300):
        kb = jax.random.fold_in(ks, batch)
        ks_b, ka_b = jax.random.split(kb)
        state = jax.random.normal(ks_b, (batch, STATE_DIM), jnp.float32)
        action = jax.random.normal(ka_b, (batch, ACTION_DIM), jnp.float32)

        logprob, value, entropy = jax.block_until_ready(
            evaluate_pallas(state, action, packed)
        )

        ref_lp, ref_v, ref_e = evaluate_ref(state, action, params, action_var)
        assert jnp.allclose(logprob, ref_lp, atol=1e-4, rtol=1e-4), batch
        assert jnp.allclose(value, ref_v, atol=1e-4, rtol=1e-4), batch
        assert jnp.allclose(entropy, ref_e, atol=1e-4, rtol=1e-4), batch

    print("KERNEL_OK")
</pallas_src>

<mosaic_0001>
module attributes {stable_mosaic.version = 11 : i64} {
  func.func @_actor_critic_kernel(%arg0: i32, %arg1: memref<16x32xf32, #tpu.memory_space<vmem>>, %arg2: memref<8x16xf32, #tpu.memory_space<vmem>>, %arg3: memref<64x32xf32, #tpu.memory_space<vmem>>, %arg4: memref<64x1xf32, #tpu.memory_space<vmem>>, %arg5: memref<64x64xf32, #tpu.memory_space<vmem>>, %arg6: memref<64x1xf32, #tpu.memory_space<vmem>>, %arg7: memref<9x64xf32, #tpu.memory_space<vmem>>, %arg8: memref<9x1xf32, #tpu.memory_space<vmem>>, %arg9: memref<9x1xf32, #tpu.memory_space<vmem>>, %arg10: memref<2x16xf32, #tpu.memory_space<vmem>>) attributes {dimension_semantics = [#tpu.dimension_semantics<parallel>], iteration_bounds = array<i64: 1>, scalar_prefetch = 0 : i64, scratch_operands = 0 : i64, tpu.core_type = #tpu.core_type<tc>, window_params = [{transform_indices = @transform_0, window_bounds = array<i64: 16, 32>}, {transform_indices = @transform_1, window_bounds = array<i64: 8, 16>}, {pipeline_mode = #tpu.pipeline_mode<synchronous>, transform_indices = @transform_2, window_bounds = array<i64: 64, 32>}, {pipeline_mode = #tpu.pipeline_mode<synchronous>, transform_indices = @transform_3, window_bounds = array<i64: 64, 1>}, {pipeline_mode = #tpu.pipeline_mode<synchronous>, transform_indices = @transform_4, window_bounds = array<i64: 64, 64>}, {pipeline_mode = #tpu.pipeline_mode<synchronous>, transform_indices = @transform_5, window_bounds = array<i64: 64, 1>}, {pipeline_mode = #tpu.pipeline_mode<synchronous>, transform_indices = @transform_6, window_bounds = array<i64: 9, 64>}, {pipeline_mode = #tpu.pipeline_mode<synchronous>, transform_indices = @transform_7, window_bounds = array<i64: 9, 1>}, {pipeline_mode = #tpu.pipeline_mode<synchronous>, transform_indices = @transform_8, window_bounds = array<i64: 9, 1>}, {transform_indices = @transform_9, window_bounds = array<i64: 2, 16>}]} {
    %c0 = arith.constant 0 : index
    %c0_0 = arith.constant 0 : index
    %0 = vector.load %arg1[%c0, %c0_0] : memref<16x32xf32, #tpu.memory_space<vmem>>, vector<16x32xf32>
    %c0_1 = arith.constant 0 : index
    %c0_2 = arith.constant 0 : index
    %1 = vector.load %arg3[%c0_1, %c0_2] : memref<64x32xf32, #tpu.memory_space<vmem>>, vector<64x32xf32>
    %cst = arith.constant dense<0.000000e+00> : vector<64x16xf32>
    %2 = tpu.matmul %1, %0, %cst {dimension_numbers = #tpu.dot_dimension_numbers<[1], [1], [0], [0], [0, 0, 1, 0], [], []>} : vector<64x32xf32>, vector<16x32xf32>, vector<64x16xf32> -> vector<64x16xf32>
    %c0_3 = arith.constant 0 : index
    %c0_4 = arith.constant 0 : index
    %3 = vector.load %arg4[%c0_3, %c0_4] : memref<64x1xf32, #tpu.memory_space<vmem>>, vector<64x1xf32>
    %4 = vector.broadcast %3 : vector<64x1xf32> to vector<64x16xf32>
    %5 = arith.addf %2, %4 : vector<64x16xf32>
    %6 = math.tanh %5 : vector<64x16xf32>
    %c0_5 = arith.constant 0 : index
    %c0_6 = arith.constant 0 : index
    %7 = vector.load %arg5[%c0_5, %c0_6] : memref<64x64xf32, #tpu.memory_space<vmem>>, vector<64x64xf32>
    %cst_7 = arith.constant dense<0.000000e+00> : vector<64x16xf32>
    %8 = tpu.matmul %7, %6, %cst_7 {dimension_numbers = #tpu.dot_dimension_numbers<[1], [0], [0], [1], [0, 0, 1, 1], [], []>} : vector<64x64xf32>, vector<64x16xf32>, vector<64x16xf32> -> vector<64x16xf32>
    %c0_8 = arith.constant 0 : index
    %c0_9 = arith.constant 0 : index
    %9 = vector.load %arg6[%c0_8, %c0_9] : memref<64x1xf32, #tpu.memory_space<vmem>>, vector<64x1xf32>
    %10 = vector.broadcast %9 : vector<64x1xf32> to vector<64x16xf32>
    %11 = arith.addf %8, %10 : vector<64x16xf32>
    %12 = math.tanh %11 : vector<64x16xf32>
    %c0_10 = arith.constant 0 : index
    %c0_11 = arith.constant 0 : index
    %13 = vector.load %arg7[%c0_10, %c0_11] : memref<9x64xf32, #tpu.memory_space<vmem>>, vector<9x64xf32>
    %cst_12 = arith.constant dense<0.000000e+00> : vector<9x16xf32>
    %14 = tpu.matmul %13, %12, %cst_12 {dimension_numbers = #tpu.dot_dimension_numbers<[1], [0], [0], [1], [0, 0, 1, 1], [], []>} : vector<9x64xf32>, vector<64x16xf32>, vector<9x16xf32> -> vector<9x16xf32>
    %c0_13 = arith.constant 0 : index
    %c0_14 = arith.constant 0 : index
    %15 = vector.load %arg8[%c0_13, %c0_14] : memref<9x1xf32, #tpu.memory_space<vmem>>, vector<9x1xf32>
    %16 = vector.broadcast %15 : vector<9x1xf32> to vector<9x16xf32>
    %17 = arith.addf %14, %16 : vector<9x16xf32>
    %18 = vector.extract_strided_slice %17 {offsets = [0, 0], sizes = [8, 16], strides = [1, 1]} : vector<9x16xf32> to vector<8x16xf32>
    %19 = math.tanh %18 : vector<8x16xf32>
    %20 = vector.extract_strided_slice %17 {offsets = [8, 0], sizes = [1, 16], strides = [1, 1]} : vector<9x16xf32> to vector<1x16xf32>
    %c0_15 = arith.constant 0 : index
    %c0_16 = arith.constant 0 : index
    %21 = vector.load %arg9[%c0_15, %c0_16] : memref<9x1xf32, #tpu.memory_space<vmem>>, vector<9x1xf32>
    %22 = vector.extract_strided_slice %21 {offsets = [0, 0], sizes = [8, 1], strides = [1, 1]} : vector<9x1xf32> to vector<8x1xf32>
    %23 = vector.extract_strided_slice %21 {offsets = [8, 0], sizes = [1, 1], strides = [1, 1]} : vector<9x1xf32> to vector<1x1xf32>
    %c0_17 = arith.constant 0 : index
    %c0_18 = arith.constant 0 : index
    %24 = vector.load %arg2[%c0_17, %c0_18] : memref<8x16xf32, #tpu.memory_space<vmem>>, vector<8x16xf32>
    %25 = arith.subf %24, %19 : vector<8x16xf32>
    %26 = arith.mulf %25, %25 : vector<8x16xf32>
    %27 = vector.broadcast %22 : vector<8x1xf32> to vector<8x16xf32>
    %28 = arith.mulf %26, %27 : vector<8x16xf32>
    %cst_19 = arith.constant dense<0.000000e+00> : vector<16xf32>
    %29 = vector.multi_reduction <add>, %28, %cst_19 [0] : vector<8x16xf32> to vector<16xf32>
    %30 = vector.shape_cast %29 : vector<16xf32> to vector<1x16xf32>
    %31 = vector.broadcast %23 : vector<1x1xf32> to vector<1x16xf32>
    %32 = arith.addf %30, %31 : vector<1x16xf32>
    %c0_20 = arith.constant 0 : index
    %c0_21 = arith.constant 0 : index
    %33 = vector.load %arg10[%c0_20, %c0_21] : memref<2x16xf32, #tpu.memory_space<vmem>>, vector<1x16xf32>
    tpu.vector_store %arg10[%c0_20, %c0_21], %32 {strides = array<i32>} : memref<2x16xf32, #tpu.memory_space<vmem>>, vector<1x16xf32>,
    %c1 = arith.constant 1 : index
    %c0_22 = arith.constant 0 : index
    %34 = vector.load %arg10[%c1, %c0_22] : memref<2x16xf32, #tpu.memory_space<vmem>>, vector<1x16xf32>
    tpu.vector_store %arg10[%c1, %c0_22], %20 {strides = array<i32>} : memref<2x16xf32, #tpu.memory_space<vmem>>, vector<1x16xf32>,
    return
  }
  func.func @transform_0(%arg0: i32) -> (i32, i32) {
    %c0_i32 = arith.constant 0 : i32
    %c0_i32_0 = arith.constant 0 : i32
    return %arg0, %c0_i32 : i32, i32
  }
  func.func @transform_1(%arg0: i32) -> (i32, i32) {
    %c0_i32 = arith.constant 0 : i32
    %c0_i32_0 = arith.constant 0 : i32
    return %c0_i32, %arg0 : i32, i32
  }
  func.func @transform_2(%arg0: i32) -> (i32, i32) {
    %c0_i32 = arith.constant 0 : i32
    %c0_i32_0 = arith.constant 0 : i32
    %c0_i32_1 = arith.constant 0 : i32
    return %c0_i32, %c0_i32_0 : i32, i32
  }
  func.func @transform_3(%arg0: i32) -> (i32, i32) {
    %c0_i32 = arith.constant 0 : i32
    %c0_i32_0 = arith.constant 0 : i32
    %c0_i32_1 = arith.constant 0 : i32
    return %c0_i32, %c0_i32_0 : i32, i32
  }
  func.func @transform_4(%arg0: i32) -> (i32, i32) {
    %c0_i32 = arith.constant 0 : i32
    %c0_i32_0 = arith.constant 0 : i32
    %c0_i32_1 = arith.constant 0 : i32
    return %c0_i32, %c0_i32_0 : i32, i32
  }
  func.func @transform_5(%arg0: i32) -> (i32, i32) {
    %c0_i32 = arith.constant 0 : i32
    %c0_i32_0 = arith.constant 0 : i32
    %c0_i32_1 = arith.constant 0 : i32
    return %c0_i32, %c0_i32_0 : i32, i32
  }
  func.func @transform_6(%arg0: i32) -> (i32, i32) {
    %c0_i32 = arith.constant 0 : i32
    %c0_i32_0 = arith.constant 0 : i32
    %c0_i32_1 = arith.constant 0 : i32
    return %c0_i32, %c0_i32_0 : i32, i32
  }
  func.func @transform_7(%arg0: i32) -> (i32, i32) {
    %c0_i32 = arith.constant 0 : i32
    %c0_i32_0 = arith.constant 0 : i32
    %c0_i32_1 = arith.constant 0 : i32
    return %c0_i32, %c0_i32_0 : i32, i32
  }
  func.func @transform_8(%arg0: i32) -> (i32, i32) {
    %c0_i32 = arith.constant 0 : i32
    %c0_i32_0 = arith.constant 0 : i32
    %c0_i32_1 = arith.constant 0 : i32
    return %c0_i32, %c0_i32_0 : i32, i32
  }
  func.func @transform_9(%arg0: i32) -> (i32, i32) {
    %c0_i32 = arith.constant 0 : i32
    %c0_i32_0 = arith.constant 0 : i32
    return %c0_i32, %arg0 : i32, i32
  }
}

</mosaic_0001>

<bundles_post_ra>
// kernel: tpu_custom_call.1
= control target key start
LH: loop header
LB: loop body
LE: loop exit
PB: predicated region body
PF: predicated region fallthrough
CT: control target
= control target key end

     0   :  { %vm91_vm0 = vcmask 261120   ;;  %v484_v3 = vmov 0   ;;  %s686_s0 = inlined_call_operand.vmem [shape: f32[16,32], index: 0, kind: input, shape index: {}]   ;;  %s687_s1 = inlined_call_operand.vmem [shape: f32[8,16], index: 1, kind: input, shape index: {}]   ;;  %s688_s2 = inlined_call_operand.vmem [shape: f32[64,32], index: 2, kind: input, shape index: {}]   ;;  %s689_s3 = inlined_call_operand.vmem [shape: f32[64,1], index: 3, kind: input, shape index: {}]   ;;  %s690_s4 = inlined_call_operand.vmem [shape: f32[64,64], index: 4, kind: input, shape index: {}]   ;;  %s691_s5 = inlined_call_operand.vmem [shape: f32[64,1], index: 5, kind: input, shape index: {}]   ;;  %s692_s6 = inlined_call_operand.vmem [shape: f32[9,64], index: 6, kind: input, shape index: {}]   ;;  %s693_s7 = inlined_call_operand.vmem [shape: f32[9,1], index: 7, kind: input, shape index: {}]   ;;  %s694_s8 = inlined_call_operand.vmem [shape: f32[9,1], index: 8, kind: input, shape index: {}]   ;;  %s695_s9 = inlined_call_operand.hbm [shape: f32[2,16], index: 9, kind: output, shape index: {}]  }
   0x1   :  { %v34_v0 = vld [vmem:[%s686_s0 + $0x8] sm:$0xff]  ;;  %v50_v1 = vld [vmem:[%s689_s3 + $0x38] sm:$0xff]  ;;  %422 = vset.pattern.permute.xlu1 %v484_v3  ;;  %421 = vset.pattern.permute.xlu0 %v484_v3  ;;  %v33_v4 = vld [vmem:[%s686_s0] sm:$0xff] }
   0x2   :  { %v48_v2 = vld [vmem:[%s689_s3 + $0x28] sm:$0xff]  ;;  %389 = vmatpush.xpose.msk.msra.mxu0 %vm91_vm0, %v34_v0  ;;  %409 = vmatpush.xpose.msk.msra.mxu2 %vm91_vm0, %v34_v0  ;;  %v46_v5 = vld [vmem:[%s689_s3 + $0x18] sm:$0xff]  ;;  %v35_v6 = vld [vmem:[%s688_s2] sm:$0xff] }
   0x3   :  { %88 = vperm.xlu0 %421, %v50_v1   ;;  %78 = vperm.xlu1 %422, %v48_v2   ;;  %v40_v7 = vld [vmem:[%s688_s2 + $0x28] sm:$0xff] }
   0x4   :  { %423 = vset.pattern.permute.xlu2 %v484_v3 }
   0x5   :  { %68 = vperm.xlu2 %423, %v46_v5  }
   0x6   :  { %390 = vmatpush.xpose.msk.msra.mxu0 %vm91_vm0, %v33_v4  ;;  %410 = vmatpush.xpose.msk.msra.mxu2 %vm91_vm0, %v33_v4 }
   0x7   :  { %14 = vsyncpa [#allocation3], 0  ;;  %v49_v8 = vld [vmem:[%s689_s3 + $0x30] sm:$0xff]  ;;  %v47_v9 = vld [vmem:[%s689_s3 + $0x20] sm:$0xff]  ;;  %vm227_vm1 = vcmask 523264   ;;  %vm370_vm2 = vcmask 122880  }
   0x8   :  { %v45_v10 = vld [vmem:[%s689_s3 + $0x10] sm:$0xff]  ;;  %v36_v11 = vld [vmem:[%s688_s2 + $0x8] sm:$0xff]  ;;  %v43_v14 = vld [vmem:[%s689_s3] sm:$0xff]  ;;  %vm356_vm3 = vcmask 130048   ;;  %s380_s20 = sshll.u32 %s695_s9, 4  ;;  %s381_s20 = int_to_ptr.hbm [resolvable:$true] %s380_s20 }
   0x9   :  { %391 = vmatmul.msk.f32.vlgmr.msra.gmra.mxu0 %vm91_vm0, %v35_v6  ;;  %396 = vmatmul.msk.f32.vlgmr.msra.gmra.mxu2 %vm91_vm0, %v40_v7  ;;  %v41_v12 = vld [vmem:[%s688_s2 + $0x30] sm:$0xff]  ;;  %v44_v13 = vld [vmem:[%s689_s3 + $0x8] sm:$0xff]  ;;  %v186_v15 = vld [vmem:[%s691_s5 + $0x38] sm:$0xff] }
   0xa   :  { %v37_v16 = vld [vmem:[%s688_s2 + $0x10] sm:$0xff]  ;;  %v42_v17 = vld [vmem:[%s688_s2 + $0x38] sm:$0xff]  ;;  %v184_v19 = vld [vmem:[%s691_s5 + $0x28] sm:$0xff] }
   0xb   :  { %83 = vperm.xlu0 %421, %v49_v8   ;;  %73 = vperm.xlu1 %422, %v47_v9   ;;  %v185_v18 = vld [vmem:[%s691_s5 + $0x30] sm:$0xff]  ;;  %v183_v20 = vld [vmem:[%s691_s5 + $0x20] sm:$0xff]  ;;  %v38_v21 = vld [vmem:[%s688_s2 + $0x18] sm:$0xff] }
   0xc   :  { %v182_v22 = vld [vmem:[%s691_s5 + $0x18] sm:$0xff]  ;;  %v181_v23 = vld [vmem:[%s691_s5 + $0x10] sm:$0xff]  ;;  %v180_v24 = vld [vmem:[%s691_s5 + $0x8] sm:$0xff] }
   0xd   :  { %63 = vperm.xlu2 %423, %v45_v10   ;;  %v39_v25 = vld [vmem:[%s688_s2 + $0x20] sm:$0xff]  ;;  %v304_v29 = vld [vmem:[%s693_s7 + $0x8] sm:$0x1]  ;;  %v173_v3 = vld [vmem:[%s690_s4 + $0x10] sm:$0xff] }
   0xe   :  { %v179_v26 = vld [vmem:[%s691_s5] sm:$0xff]  ;;  %v346_v30 = vld [vmem:[%s694_s8 + $0x8] sm:$0x1]  ;;  %v177_v4 = vld [vmem:[%s690_s4 + $0x30] sm:$0xff] }
   0xf   :  { %v303_v27 = vld [vmem:[%s693_s7] sm:$0xff]  ;;  %v172_v1 = vld [vmem:[%s690_s4 + $0x8] sm:$0xff]  ;;  %v174_v5 = vld [vmem:[%s690_s4 + $0x18] sm:$0xff] }
  0x10   :  { %v345_v28 = vld [vmem:[%s694_s8] sm:$0xff]  ;;  %v176_v2 = vld [vmem:[%s690_s4 + $0x28] sm:$0xff]  ;;  %v178_v6 = vld [vmem:[%s690_s4 + $0x38] sm:$0xff] }
  0x11   :  { %392 = vmatmul.msk.f32.gmra.mxu0 %vm91_vm0, %v36_v11  ;;  %397 = vmatmul.msk.f32.gmra.mxu2 %vm91_vm0, %v41_v12  ;;  %v171_v62 = vld [vmem:[%s690_s4] sm:$0xff] }
  0x12   :  { %v175_v63 = vld [vmem:[%s690_s4 + $0x20] sm:$0xff] }
  0x13   :  { %58 = vperm.xlu0 %421, %v44_v13   ;;  %53 = vperm.xlu1 %422, %v43_v14  }
  0x15   :  { %224 = vperm.xlu2 %423, %v186_v15  }
  0x19   :  { %393 = vmatmul.msk.f32.gmra.mxu0 %vm91_vm0, %v37_v16  ;;  %398 = vmatmul.msk.f32.gmra.mxu2 %vm91_vm0, %v42_v17 }
  0x1b   :  { %219 = vperm.xlu0 %421, %v185_v18   ;;  %214 = vperm.xlu1 %422, %v184_v19  }
  0x1d   :  { %209 = vperm.xlu2 %423, %v183_v20  }
  0x21   :  { %394 = vmatmul.msk.f32.gmra.mxu0 %vm91_vm0, %v38_v21 }
  0x23   :  { %204 = vperm.xlu0 %421, %v182_v22   ;;  %199 = vperm.xlu1 %422, %v181_v23  }
  0x25   :  { %194 = vperm.xlu2 %423, %v180_v24  }
  0x29   :  { %395 = vmatmul.msk.f32.gmra.mxu0 %vm91_vm0, %v39_v25 }
  0x2b   :  { %189 = vperm.xlu0 %421, %v179_v26   ;;  %307 = vperm.xlu1 %422, %v303_v27  }
  0x2d   :  { %352 = vperm.xlu2 %423, %v345_v28  }
  0x33   :  { %312 = vperm.xlu0 %421, %v304_v29   ;;  %366 = vperm.xlu1 %422, %v346_v30  }
  0x5f   :  { %v69_v42 = vpop.permute.xlu2 %68 }
  0x67   :  { %v64_v51 = vpop.permute.xlu2 %63 }
  0x6f   :  { %v225_v11 = vpop.permute.xlu2 %224 }
  0x75   :  { %v89_v34 = vpop.permute.xlu0 %88  ;;  %v79_v36 = vpop.permute.xlu1 %78 }
  0x77   :  { %v210_v16 = vpop.permute.xlu2 %209 }
  0x7d   :  { %v84_v38 = vpop.permute.xlu0 %83  ;;  %v74_v45 = vpop.permute.xlu1 %73 }
  0x7f   :  { %v195_v28 = vpop.permute.xlu2 %194 }
  0x85   :  { %v59_v54 = vpop.permute.xlu0 %58  ;;  %v54_v55 = vpop.permute.xlu1 %53 }
  0x86   :  { %v139_v31 = vpop.f32.mrf.mxu0 }
  0x87   :  { %v140_v57 = vadd.f32 %v139_v31, %v54_v55 }
  0x8c   :  { %v154_v32 = vpop.f32.mrf.mxu2 }
  0x8d   :  { %v155_v44 = vadd.f32 %v154_v32, %v79_v36  ;;  %v220_v12 = vpop.permute.xlu0 %219  ;;  %v215_v15 = vpop.permute.xlu1 %214 }
  0x8e   :  { %v142_v33 = vpop.f32.mrf.mxu0 }
  0x8f   :  { %v143_v56 = vadd.f32 %v142_v33, %v59_v54 }
  0x94   :  { %v157_v35 = vpop.f32.mrf.mxu2 }
  0x95   :  { %v158_v40 = vadd.f32 %v157_v35, %v84_v38  ;;  %v205_v20 = vpop.permute.xlu0 %204  ;;  %v200_v25 = vpop.permute.xlu1 %199  ;;  %v301_v38 = vld [vmem:[%s692_s6] sm:$0xff] }
  0x96   :  { %v145_v37 = vpop.f32.mrf.mxu0 }
  0x97   :  { %v146_v53 = vadd.f32 %v145_v37, %v64_v51  ;;  %v353_v51 = vpop.permute.xlu2 %352 }
  0x9c   :  { %v160_v39 = vpop.f32.mrf.mxu2 }
  0x9d   :  { %v161_v41 = vadd.f32 %v160_v39, %v89_v34  ;;  %v190_v31 = vpop.permute.xlu0 %189 }
  0x9e   :  { %v148_v43 = vpop.f32.mrf.mxu0 }
  0x9f   :  { %424 = vtanh.f32 %v161_v41  ;;  %v149_v49 = vadd.f32 %v148_v43, %v69_v42  ;;  %v308_v41 = vpop.permute.xlu1 %307 }
  0xa0   :  { %426 = vtanh.f32 %v158_v40  ;;  %v302_v40 = vld [vmem:[%s692_s6 + $0x8] sm:$0x1]  ;;  %s485_s6 = smov [#allocation2]  }
  0xa1   :  { %428 = vtanh.f32 %v155_v44  ;;  %v347_v44 = vld [vmem:[%s687_s1] sm:$0xff]  ;;  %s378_s1 = sshll.u32 %s485_s6, 4  ;;  %s379_s1 = int_to_ptr.vmem [resolvable:$true] %s378_s1 }
  0xa5   :  { %v425_v46 = vpop.eup %424 }
  0xa6   :  { %v151_v47 = vpop.f32.mrf.mxu0  ;;  %260 = vmatpush.msra.mxu1 %v425_v46  ;;  %411 = vmatpush.msra.mxu3 %v425_v46  ;;  %v427_v48 = vpop.eup %426 }
  0xa7   :  { %v152_v50 = vadd.f32 %v151_v47, %v74_v45  ;;  %v429_v52 = vpop.eup %428  ;;  %v313_v45 = vpop.permute.xlu0 %312 }
  0xa8   :  { %261 = vmatpush.msra.mxu1 %v427_v48  ;;  %412 = vmatpush.msra.mxu3 %v427_v48 }
  0xa9   :  { %430 = vtanh.f32 %v152_v50 }
  0xaa   :  { %262 = vmatpush.msra.mxu1 %v429_v52  ;;  %413 = vmatpush.msra.mxu3 %v429_v52  ;;  %432 = vtanh.f32 %v149_v49 }
  0xab   :  { %434 = vtanh.f32 %v146_v53 }
  0xac   :  { %436 = vtanh.f32 %v143_v56 }
  0xad   :  { %438 = vtanh.f32 %v140_v57 }
  0xaf   :  { %v431_v58 = vpop.eup %430 }
  0xb0   :  { %263 = vmatpush.msra.mxu1 %v431_v58  ;;  %414 = vmatpush.msra.mxu3 %v431_v58  ;;  %v433_v59 = vpop.eup %432 }
  0xb1   :  { %v435_v60 = vpop.eup %434 }
  0xb2   :  { %264 = vmatpush.msra.mxu1 %v433_v59  ;;  %415 = vmatpush.msra.mxu3 %v433_v59  ;;  %v437_v61 = vpop.eup %436 }
  0xb3   :  { %v439_v0 = vpop.eup %438 }
  0xb4   :  { %265 = vmatpush.msra.mxu1 %v435_v60  ;;  %416 = vmatpush.msra.mxu3 %v435_v60  ;;  %v367_v60 = vpop.permute.xlu1 %366 }
  0xb6   :  { %266 = vmatpush.msra.mxu1 %v437_v61  ;;  %417 = vmatpush.msra.mxu3 %v437_v61 }
  0xb8   :  { %267 = vmatpush.msra.mxu1 %v439_v0  ;;  %418 = vmatpush.msra.mxu3 %v439_v0 }
  0xb9   :  { %399 = vmatmul.msk.f32.vlgmr.msra.gmra.mxu1 %vm227_vm1, %v171_v62  ;;  %403 = vmatmul.msk.f32.vlgmr.msra.gmra.mxu3 %vm227_vm1, %v175_v63 }
  0xc1   :  { %400 = vmatmul.msk.f32.gmra.mxu1 %vm227_vm1, %v172_v1  ;;  %404 = vmatmul.msk.f32.gmra.mxu3 %vm227_vm1, %v176_v2 }
  0xc9   :  { %401 = vmatmul.msk.f32.gmra.mxu1 %vm227_vm1, %v173_v3  ;;  %405 = vmatmul.msk.f32.gmra.mxu3 %vm227_vm1, %v177_v4 }
  0xd1   :  { %402 = vmatmul.msk.f32.gmra.mxu1 %vm227_vm1, %v174_v5  ;;  %406 = vmatmul.msk.f32.gmra.mxu3 %vm227_vm1, %v178_v6 }
 0x136   :  { %v269_v7 = vpop.f32.mrf.mxu1 }
 0x137   :  { %v270_v33 = vadd.f32 %v269_v7, %v190_v31 }
 0x13c   :  { %v281_v8 = vpop.f32.mrf.mxu3 }
 0x13d   :  { %v282_v23 = vadd.f32 %v281_v8, %v210_v16 }
 0x13e   :  { %v272_v9 = vpop.f32.mrf.mxu1 }
 0x13f   :  { %v273_v30 = vadd.f32 %v272_v9, %v195_v28 }
 0x144   :  { %v284_v10 = vpop.f32.mrf.mxu3 }
 0x145   :  { %v285_v21 = vadd.f32 %v284_v10, %v215_v15 }
 0x146   :  { %v275_v14 = vpop.f32.mrf.mxu1 }
 0x147   :  { %v276_v27 = vadd.f32 %v275_v14, %v200_v25 }
 0x14c   :  { %v287_v13 = vpop.f32.mrf.mxu3 }
 0x14d   :  { %v288_v18 = vadd.f32 %v287_v13, %v220_v12 }
 0x14e   :  { %v278_v22 = vpop.f32.mrf.mxu1 }
 0x14f   :  { %v279_v24 = vadd.f32 %v278_v22, %v205_v20 }
 0x154   :  { %v290_v17 = vpop.f32.mrf.mxu3 }
 0x155   :  { %v291_v19 = vadd.f32 %v290_v17, %v225_v11 }
 0x157   :  { %440 = vtanh.f32 %v291_v19 }
 0x158   :  { %442 = vtanh.f32 %v288_v18 }
 0x159   :  { %444 = vtanh.f32 %v285_v21 }
 0x15a   :  { %446 = vtanh.f32 %v282_v23 }
 0x15b   :  { %448 = vtanh.f32 %v279_v24 }
 0x15c   :  { %450 = vtanh.f32 %v276_v27 }
 0x15d   :  { %v441_v26 = vpop.eup %440  ;;  %452 = vtanh.f32 %v273_v30 }
 0x15e   :  { %329 = vmatpush.msrb.mxu2 %v441_v26  ;;  %v443_v29 = vpop.eup %442  ;;  %454 = vtanh.f32 %v270_v33 }
 0x15f   :  { %v445_v32 = vpop.eup %444 }
 0x160   :  { %330 = vmatpush.msrb.mxu2 %v443_v29  ;;  %v447_v34 = vpop.eup %446 }
 0x161   :  { %v449_v35 = vpop.eup %448 }
 0x162   :  { %331 = vmatpush.msrb.mxu2 %v445_v32  ;;  %v451_v36 = vpop.eup %450 }
 0x163   :  { %v453_v37 = vpop.eup %452 }
 0x164   :  { %332 = vmatpush.msrb.mxu2 %v447_v34  ;;  %v455_v39 = vpop.eup %454 }
 0x166   :  { %333 = vmatpush.msrb.mxu2 %v449_v35 }
 0x168   :  { %334 = vmatpush.msrb.mxu2 %v451_v36 }
 0x16a   :  { %335 = vmatpush.msrb.mxu2 %v453_v37 }
 0x16c   :  { %336 = vmatpush.msrb.mxu2 %v455_v39 }
 0x16d   :  { %407 = vmatmul.msk.f32.vlgmr.msrb.gmra.mxu2 %vm227_vm1, %v301_v38 }
 0x175   :  { %408 = vmatmul.msk.f32.gmra.mxu2 %vm227_vm1, %v302_v40 }
 0x1f0   :  { %v338_v42 = vpop.f32.mrf.mxu2 }
 0x1f1   :  { %v339_v43 = vadd.f32 %v338_v42, %v308_v41 }
 0x1f3   :  { %456 = vtanh.f32 %v339_v43 }
 0x1f8   :  { %v341_v46 = vpop.f32.mrf.mxu2 }
 0x1f9   :  { %v457_v47 = vpop.eup %456  ;;  %v342_v48 = vadd.f32 %v341_v46, %v313_v45 }
 0x1fa   :  { %v348_v49 = vsub.f32 %v347_v44, %v457_v47 }
 0x1fb   :  { %372 = vst.msk [vmem:[#allocation2 + $0x1] sm:$0x1] %vm370_vm2, %v342_v48 }
 0x1fc   :  { %v349_v50 = vmul.f32 %v348_v49, %v348_v49 }
 0x1fe   :  { %v355_v52 = vmul.f32 %v353_v51, %v349_v50 }
 0x200   :  { %v357_v53 = vsel %vm356_vm3, %v355_v52, 0.0 }
 0x201   :  { %v358_v54 = vrot.slane %v357_v53, 4 }
 0x203   :  { %v359_v55 = vadd.f32 %v358_v54, %v357_v53 }
 0x205   :  { %v360_v56 = vrot.slane %v359_v55, 2 }
 0x207   :  { %v361_v57 = vadd.f32 %v360_v56, %v359_v55 }
 0x209   :  { %v362_v58 = vrot.slane %v361_v57, 1 }
 0x20b   :  { %v363_v59 = vadd.f32 %v362_v58, %v361_v57 }
 0x20d   :  { %v369_v61 = vadd.f32 %v367_v60, %v363_v59 }
 0x20f   :  { %371 = vst.msk [vmem:[#allocation2] sm:$0x1] %vm370_vm2, %v369_v61 }
 0x210   :  { %383 = dma.vmem_to_hbm [thread:$0]  %s379_s1, 32, %s381_s20, [#allocation3]  }
 0x211   :  { %482 = dma.done.wait [#allocation3], 32  }
 0x212   :  { %483 = vsyncadd [#allocation3], 4294967264 }
 0x213   :  { %388 = vsyncpa [#allocation3], 1 }

</bundles_post_ra>
